<compile_context>
chip_gen: v6e
topology: v6e:2x2x1
jax: 0.10.0
libtpu: 0.0.40
codegen_flags: <defaults>
</compile_context>

<pallas_src>
import functools

import jax
import jax.numpy as jnp
from jax.experimental import pallas as pl
from jax.experimental.pallas import tpu as pltpu


# ---------------------------------------------------------------------------
# Kernels.  All refs are laid out (1, C, TA): classes on sublanes, anchors on
# lanes.  Weights are (1, 1, TA) and broadcast over the sublane axis.
# ---------------------------------------------------------------------------
def _bce_with_logits(x, z):
    # max(x, 0) - x * z + log1p(exp(-|x|))  (numerically stable BCE-with-logits)
    return jnp.maximum(x, 0.0) - x * z + jnp.log1p(jnp.exp(-jnp.abs(x)))


def _wce_none_weighted_kernel(x_ref, z_ref, w_ref, o_ref):
    x = x_ref[...].astype(jnp.float32)      # (1, C, TA)
    z = z_ref[...].astype(jnp.float32)      # (1, C, TA)
    w = w_ref[...].astype(jnp.float32)      # (1, 1, TA) -> broadcasts over C
    o_ref[...] = (w * _bce_with_logits(x, z)).astype(o_ref.dtype)


def _wce_none_kernel(x_ref, z_ref, o_ref):
    x = x_ref[...].astype(jnp.float32)
    z = z_ref[...].astype(jnp.float32)
    o_ref[...] = _bce_with_logits(x, z).astype(o_ref.dtype)


def _wce_reduce_weighted_kernel(x_ref, z_ref, w_ref, o_ref, *, scale):
    x = x_ref[...].astype(jnp.float32)
    z = z_ref[...].astype(jnp.float32)
    w = w_ref[...].astype(jnp.float32)
    loss = w * _bce_with_logits(x, z)                          # (1, C, TA)
    o_ref[...] = (jnp.sum(loss, axis=1, keepdims=True) * scale).astype(o_ref.dtype)


def _wce_reduce_kernel(x_ref, z_ref, o_ref, *, scale):
    x = x_ref[...].astype(jnp.float32)
    z = z_ref[...].astype(jnp.float32)
    loss = _bce_with_logits(x, z)
    o_ref[...] = (jnp.sum(loss, axis=1, keepdims=True) * scale).astype(o_ref.dtype)


# ---------------------------------------------------------------------------
# Wrapper
# ---------------------------------------------------------------------------
def _round_up(x, m):
    return (x + m - 1) // m * m


def weighted_classification_loss(input, target, weights=None, reduction="none",
                                 *, block_anchors=16384):
    """JAX/Pallas equivalent of WeightedClassificationLoss.forward.

    input:   (B, A, C) float logits            (or (A, C) for the 2-D path)
    target:  (B, A, C) float one-hot targets   (or (A, C))
    weights: optional (B, A) anchor weights    (or (A,) for 2-D inputs,
             or (B, A, 1))
    reduction: 'none' | 'sum' | 'mean'  (reduction over the class axis)
    """
    input = jnp.asarray(input)
    target = jnp.asarray(target)

    squeeze_batch = False
    if input.ndim == 2:                      # (A, C) path from the docstring
        input = input[None]
        target = target[None]
        if weights is not None:
            weights = jnp.asarray(weights)
            if weights.ndim == 1:
                weights = weights[None]      # (A,) -> (1, A)
        squeeze_batch = True

    B, A, C = input.shape
    out_dtype = jnp.result_type(input.dtype, target.dtype)

    if weights is not None:
        weights = jnp.asarray(weights)
        if weights.ndim == 3:                # already (B, A, 1)
            assert weights.shape[-1] == 1
            weights = weights[..., 0]
        assert weights.shape == (B, A)
        out_dtype = jnp.result_type(out_dtype, weights.dtype)

    # --- lane-dense relayout: anchors on lanes, classes on sublanes ---------
    x_t = jnp.transpose(input, (0, 2, 1))    # (B, C, A)
    z_t = jnp.transpose(target, (0, 2, 1))   # (B, C, A)

    ta = min(int(block_anchors), _round_up(A, 128))   # lane-tile, multiple of 128
    a_pad = _round_up(A, ta)
    if a_pad != A:
        pad = a_pad - A
        x_t = jnp.pad(x_t, ((0, 0), (0, 0), (0, pad)))
        z_t = jnp.pad(z_t, ((0, 0), (0, 0), (0, pad)))

    w3 = None
    if weights is not None:
        w_pad = weights if a_pad == A else jnp.pad(weights, ((0, 0), (0, a_pad - A)))
        w3 = w_pad.reshape(B, 1, a_pad)      # lane-dense, broadcast over C in-kernel

    grid = (B, a_pad // ta)
    xz_spec = pl.BlockSpec((1, C, ta), lambda b, a: (b, 0, a))
    w_spec = pl.BlockSpec((1, 1, ta), lambda b, a: (b, 0, a))
    compiler_params = pltpu.CompilerParams(
        dimension_semantics=("parallel", "parallel"))

    if reduction in ("sum", "mean"):
        # Fused class-axis reduction: output is (B, A), lane-dense.
        scale = 1.0 if reduction == "sum" else 1.0 / C
        out_spec = pl.BlockSpec((1, 1, ta), lambda b, a: (b, 0, a))
        out_shape = jax.ShapeDtypeStruct((B, 1, a_pad), out_dtype)
        if weights is not None:
            kern = functools.partial(_wce_reduce_weighted_kernel, scale=scale)
            red = pl.pallas_call(
                kern, out_shape=out_shape, grid=grid,
                in_specs=[xz_spec, xz_spec, w_spec], out_specs=out_spec,
                compiler_params=compiler_params,
            )(x_t, z_t, w3)
        else:
            kern = functools.partial(_wce_reduce_kernel, scale=scale)
            red = pl.pallas_call(
                kern, out_shape=out_shape, grid=grid,
                in_specs=[xz_spec, xz_spec], out_specs=out_spec,
                compiler_params=compiler_params,
            )(x_t, z_t)
        loss = red.reshape(B, a_pad)[:, :A]
        return loss[0] if squeeze_batch else loss

    # reduction == 'none' (and any other string falls through unreduced,
    # matching the PyTorch module's behavior).
    out_spec = pl.BlockSpec((1, C, ta), lambda b, a: (b, 0, a))
    out_shape = jax.ShapeDtypeStruct((B, C, a_pad), out_dtype)
    if weights is not None:
        loss_t = pl.pallas_call(
            _wce_none_weighted_kernel, out_shape=out_shape, grid=grid,
            in_specs=[xz_spec, xz_spec, w_spec], out_specs=out_spec,
            compiler_params=compiler_params,
        )(x_t, z_t, w3)
    else:
        loss_t = pl.pallas_call(
            _wce_none_kernel, out_shape=out_shape, grid=grid,
            in_specs=[xz_spec, xz_spec], out_specs=out_spec,
            compiler_params=compiler_params,
        )(x_t, z_t)
    loss = jnp.transpose(loss_t, (0, 2, 1))[:, :A, :]
    return loss[0] if squeeze_batch else loss


# ---------------------------------------------------------------------------
# Pure-JAX reference + self-test
# ---------------------------------------------------------------------------
def _reference(input, target, weights=None, reduction="none"):
    x = jnp.asarray(input, jnp.float32)
    z = jnp.asarray(target, jnp.float32)
    bce = jnp.maximum(x, 0.0) - x * z + jnp.log1p(jnp.exp(-jnp.abs(x)))
    if weights is not None:
        bce = jnp.asarray(weights, jnp.float32)[..., None] * bce
    if reduction == "sum":
        return jnp.sum(bce, axis=-1)
    if reduction == "mean":
        return jnp.mean(bce, axis=-1)
    return bce


if __name__ == "__main__":
    # Small shapes consistent with (B, #anchors, #classes); A is deliberately
    # not a multiple of 128 to exercise the padding path.
    B, A, C = 2, 200, 3
    key = jax.random.PRNGKey(0)
    k1, k2, k3 = jax.random.split(key, 3)

    logits = jax.random.normal(k1, (B, A, C), dtype=jnp.float32) * 2.0
    labels = jax.nn.one_hot(
        jax.random.randint(k2, (B, A), 0, C), C, dtype=jnp.float32)
    weights = jax.random.uniform(k3, (B, A), dtype=jnp.float32)

    # Default path: weighted loss, no reduction.
    out = jax.block_until_ready(
        weighted_classification_loss(logits, labels, weights, reduction="none"))
    ref = _reference(logits, labels, weights, reduction="none")
    assert out.shape == (B, A, C)
    assert jnp.allclose(out, ref, atol=1e-5, rtol=1e-5)

    # Unweighted path.
    out_nw = jax.block_until_ready(
        weighted_classification_loss(logits, labels, None, reduction="none"))
    assert jnp.allclose(out_nw, _reference(logits, labels, None),
                        atol=1e-5, rtol=1e-5)

    # Fused 'sum' / 'mean' reductions over the class axis.
    out_sum = jax.block_until_ready(
        weighted_classification_loss(logits, labels, weights, reduction="sum"))
    assert out_sum.shape == (B, A)
    assert jnp.allclose(out_sum, _reference(logits, labels, weights, "sum"),
                        atol=1e-5, rtol=1e-5)

    out_mean = jax.block_until_ready(
        weighted_classification_loss(logits, labels, weights, reduction="mean"))
    assert jnp.allclose(out_mean, _reference(logits, labels, weights, "mean"),
                        atol=1e-5, rtol=1e-5)

    # 2-D (A, C) path with (A,) weights, as advertised by the module docstring.
    out_2d = jax.block_until_ready(
        weighted_classification_loss(logits[0], labels[0], weights[0],
                                     reduction="none"))
    assert out_2d.shape == (A, C)
    assert jnp.allclose(out_2d, _reference(logits[0], labels[0], weights[0]),
                        atol=1e-5, rtol=1e-5)

    print("KERNEL_OK")
</pallas_src>

<mosaic_0001>
module attributes {stable_mosaic.version = 11 : i64} {
  func.func @_wce_none_weighted_kernel(%arg0: i32, %arg1: i32, %arg2: memref<1x3x256xf32, #tpu.memory_space<vmem>>, %arg3: memref<1x3x256xf32, #tpu.memory_space<vmem>>, %arg4: memref<1x1x256xf32, #tpu.memory_space<vmem>>, %arg5: memref<1x3x256xf32, #tpu.memory_space<vmem>>) attributes {dimension_semantics = [#tpu.dimension_semantics<parallel>, #tpu.dimension_semantics<parallel>], iteration_bounds = array<i64: 2, 1>, scalar_prefetch = 0 : i64, scratch_operands = 0 : i64, tpu.core_type = #tpu.core_type<tc>, window_params = [{transform_indices = @transform_0, window_bounds = array<i64: 1, 3, 256>}, {transform_indices = @transform_1, window_bounds = array<i64: 1, 3, 256>}, {transform_indices = @transform_2, window_bounds = array<i64: 1, 1, 256>}, {transform_indices = @transform_3, window_bounds = array<i64: 1, 3, 256>}]} {
    %c0 = arith.constant 0 : index
    %c0_0 = arith.constant 0 : index
    %c0_1 = arith.constant 0 : index
    %0 = vector.load %arg2[%c0, %c0_0, %c0_1] : memref<1x3x256xf32, #tpu.memory_space<vmem>>, vector<1x3x256xf32>
    %c0_2 = arith.constant 0 : index
    %c0_3 = arith.constant 0 : index
    %c0_4 = arith.constant 0 : index
    %1 = vector.load %arg3[%c0_2, %c0_3, %c0_4] : memref<1x3x256xf32, #tpu.memory_space<vmem>>, vector<1x3x256xf32>
    %c0_5 = arith.constant 0 : index
    %c0_6 = arith.constant 0 : index
    %c0_7 = arith.constant 0 : index
    %2 = vector.load %arg4[%c0_5, %c0_6, %c0_7] : memref<1x1x256xf32, #tpu.memory_space<vmem>>, vector<1x1x256xf32>
    %cst = arith.constant 0.000000e+00 : f32
    %3 = vector.broadcast %cst : f32 to vector<1x3x256xf32>
    %4 = arith.maximumf %0, %3 : vector<1x3x256xf32>
    %5 = arith.mulf %0, %1 : vector<1x3x256xf32>
    %6 = arith.subf %4, %5 : vector<1x3x256xf32>
    %7 = math.absf %0 : vector<1x3x256xf32>
    %cst_8 = arith.constant 0.000000e+00 : f32
    %8 = vector.broadcast %cst_8 : f32 to vector<1x3x256xf32>
    %9 = arith.subf %8, %7 : vector<1x3x256xf32>
    %10 = math.exp %9 : vector<1x3x256xf32>
    %11 = math.log1p %10 : vector<1x3x256xf32>
    %12 = arith.addf %6, %11 : vector<1x3x256xf32>
    %13 = vector.broadcast %2 : vector<1x1x256xf32> to vector<1x3x256xf32>
    %14 = arith.mulf %13, %12 : vector<1x3x256xf32>
    %c0_9 = arith.constant 0 : index
    %c0_10 = arith.constant 0 : index
    %c0_11 = arith.constant 0 : index
    %15 = vector.load %arg5[%c0_9, %c0_10, %c0_11] : memref<1x3x256xf32, #tpu.memory_space<vmem>>, vector<1x3x256xf32>
    tpu.vector_store %arg5[%c0_9, %c0_10, %c0_11], %14 {strides = array<i32>} : memref<1x3x256xf32, #tpu.memory_space<vmem>>, vector<1x3x256xf32>,
    return
  }
  func.func @transform_0(%arg0: i32, %arg1: i32) -> (i32, i32, i32) {
    %c0_i32 = arith.constant 0 : i32
    %c0_i32_0 = arith.constant 0 : i32
    return %arg0, %c0_i32, %arg1 : i32, i32, i32
  }
  func.func @transform_1(%arg0: i32, %arg1: i32) -> (i32, i32, i32) {
    %c0_i32 = arith.constant 0 : i32
    %c0_i32_0 = arith.constant 0 : i32
    return %arg0, %c0_i32, %arg1 : i32, i32, i32
  }
  func.func @transform_2(%arg0: i32, %arg1: i32) -> (i32, i32, i32) {
    %c0_i32 = arith.constant 0 : i32
    %c0_i32_0 = arith.constant 0 : i32
    return %arg0, %c0_i32, %arg1 : i32, i32, i32
  }
  func.func @transform_3(%arg0: i32, %arg1: i32) -> (i32, i32, i32) {
    %c0_i32 = arith.constant 0 : i32
    %c0_i32_0 = arith.constant 0 : i32
    return %arg0, %c0_i32, %arg1 : i32, i32, i32
  }
}

</mosaic_0001>

<bundles_post_ra>
// kernel: tpu_custom_call.1
= control target key start
LH: loop header
LB: loop body
LE: loop exit
PB: predicated region body
PF: predicated region fallthrough
CT: control target
= control target key end

     0   :  { %s529_s12 = smov 0   ;;  %s531_s13 = smov 0   ;;  %s573_s0 = inlined_call_operand.vmem [shape: f32[2,3,256], index: 0, kind: input, shape index: {}]   ;;  %s574_s1 = inlined_call_operand.vmem [shape: f32[2,3,256], index: 1, kind: input, shape index: {}]   ;;  %s575_s2 = inlined_call_operand.vmem [shape: f32[2,1,256], index: 2, kind: input, shape index: {}]   ;;  %s576_s3 = inlined_call_operand.vmem [shape: f32[2,3,256], index: 3, kind: output, shape index: {}]  }
   0x1   :  { %s533_s14 = smov 0  }
   0x2 LB: > { %s25_s15 = sadd.s32 1, %s503_s13  ;;  %p444_p0 = scmp.ge.s32.totalorder %s507_s14, 1  ;;  %s507_s14 = sphi %s533_s14, %s13_s14   ;;  %s503_s13 = sphi %s531_s13, %s578_s13   ;;  %s499_s12 = sphi %s529_s12, %s577_s12  }
   0x3   : > { %p27_p1 = scmp.ge.s32.totalorder %s25_s15, 2  ;;  %p191_p2 = scmp.lt.s32.totalorder %s507_s14, 3 }
   0x5   : > { %s580_s15 = smov (%p27_p1, %s25_s15), 0  ;;  %p192_p3 = pnand %p444_p0, %p191_p2 }
   0x6   : > { %p241_p4 = scmp.lt.s32.totalorder (!%p192_p3), %s499_s12, 1 }
   0x7   : > { %195 = sbr.rel (%p192_p3) target bundleno = 64 (0x40), region = 32 }
   0xc   : > { %s582_s12 = smov (!%p241_p4, %s499_s12), 1  ;;  %v300_v6 = vlaneseq }
   0xd   : > { %s547_s16 = sshll.u32 %s582_s12, 3  ;;  %s449_s23 = sshll.u32 %s582_s12, 1 }
   0xe   : > { %s248_s19 = scalar_lea.vmem %s573_s0, %s547_s16  ;;  %s258_s22 = scalar_lea.vmem %s574_s1, %s547_s16  ;;  %v301_v9 = vshrl.u32 %v300_v6, 7 }
   0xf   : > { %v279_v0 = vld [vmem:[%s248_s19] sm:$0x77]  ;;  %s267_s26 = scalar_lea.vmem %s575_s2, %s449_s23  ;;  %s277_s29 = scalar_lea.vmem %s576_s3, %s547_s16 }
  0x10   : > { %v285_v1 = vand.u32 2147483647, %v279_v0  ;;  %v280_v8 = vld [vmem:[%s258_s22] sm:$0x77]  ;;  %v282_v11 = vmax.f32 %v279_v0, 0.0  ;;  %v302_v14 = vsub.s32 0, %v301_v9 }
  0x11   : > { %v283_v12 = vmul.f32 %v280_v8, %v279_v0  ;;  %v281_v15 = vld [vmem:[%s267_s26] sm:$0x3]  ;;  %v306_v19 = vsub.s32 1, %v301_v9 }
  0x12   : > { %v286_v2 = vsub.f32 0.0, %v285_v1  ;;  %v303_v21 = vrot.slane %v281_v15, %v302_v14 }
  0x13   : > { %v284_v18 = vsub.f32 %v282_v11, %v283_v12  ;;  %v307_v24 = vrot.slane %v281_v15, %v306_v19 }
  0x14   : > { %v287_v3 = vmul.f32 1.442695, %v286_v2 }
  0x16   : > { %481 = vpow2.f32 %v287_v3 }
  0x23   : > { %v482_v4 = vpop.eup %481 }
  0x24   : > { %v289_v5 = vadd.f32 1.0, %v482_v4  ;;  %v292_v7 = vmul.f32 -0.5, %v482_v4  ;;  %v295_v13 = vand.u32 2147483647, %v482_v4 }
  0x26   : > { %483 = vlog2.f32 %v289_v5  ;;  %v293_v10 = vadd.f32 1.0, %v292_v7  ;;  %vm296_vm0 = vcmp.lt.f32.partialorder %v295_v13, 0.0004427343 }
  0x28   : > { %v294_v16 = vmul.f32 %v482_v4, %v293_v10 }
  0x33   : > { %v484_v17 = vpop.eup %483 }
  0x34   : > { %v291_v20 = vmul.f32 0.6931472, %v484_v17 }
  0x36   : > { %v297_v22 = vsel %vm296_vm0, %v294_v16, %v291_v20 }
  0x37   : > { %v298_v23 = vadd.f32 %v297_v22, %v284_v18 }
  0x39   : > { %v311_v25 = vcombine.high %v298_v23, %v298_v23  ;;  %v313_v26 = vmul.f32 %v303_v21, %v298_v23 }
  0x3b   : > { %v314_v27 = vmul.f32 %v311_v25, %v307_v24 }
  0x3d   : > { %v317_v28 = vcombine.low %v313_v26, %v314_v27 }
  0x3f   : > { %319 = vst [vmem:[%s277_s29] sm:$0x77] %v317_v28 }
  0x40 PF: > { %s13_s14 = sadd.s32 1, %s507_s14   ;;  %s577_s12 = smov %s503_s13 }
  0x41   : > { %p10_p5 = scmp.ge.s32.totalorder %s13_s14, 4   ;;  %s578_s13 = smov %s580_s15 }
  0x43   :  { %12 = sbr.rel (!%p10_p5) target bundleno = 2 (0x2), region = 68 }

</bundles_post_ra>
